<compile_context>
chip_gen: v7x
topology: tpu7x:2x2x1
jax: 0.10.0
libtpu: 0.0.40
codegen_flags: <defaults>
</compile_context>

<pallas_src>
import functools

import jax
import jax.numpy as jnp
from jax.experimental import pallas as pl
from jax.experimental.pallas import tpu as pltpu

POOL_TYPES = ("mean", "rms", "abs")

_LANES = 128
_MAX_HW_TILE = 8192                       # caps the unrolled per-128-lane loop (64 steps)
_DEFAULT_BLOCK_BYTES = 4 * 1024 * 1024    # ~4 MiB input blocks: v5e/v6e roofline plateau
_V7X_BLOCK_BYTES = 8 * 1024 * 1024        # bigger blocks for v7x's ~3.2 TB/s HBM


def _round_up(x, m):
    return ((x + m - 1) // m) * m


def _block_byte_budget():
    """Per-input-block byte budget, biased larger on v7x (64 MiB VMEM / TC)."""
    budget = _DEFAULT_BLOCK_BYTES
    try:
        info = pltpu.get_tpu_info()
        vmem = getattr(info, "vmem_capacity_bytes", None)
        if vmem is not None and vmem <= 64 * 1024 * 1024:
            budget = _V7X_BLOCK_BYTES     # 2 x 8 MiB double-buffered << 32 MiB scoped VMEM
    except Exception:
        pass
    return budget


def _choose_blocks(rows, hw, itemsize, budget):
    """Pick (row_blk, hw_blk) for the flat (rows=N*C, hw=H*W) view."""
    sub = max(8, 32 // max(1, itemsize))   # packed sublane tile: 8 f32 / 16 bf16 / 32 i8
    rows_al = _round_up(rows, sub)

    if hw <= _MAX_HW_TILE and hw * itemsize * min(256, rows_al) <= budget:
        # Whole spatial extent in one chunk (exact: no tail masking needed);
        # spend the remaining budget on rows.
        hw_blk = hw
        row_cap = max(sub, min(512, (budget // max(1, hw * itemsize)) // sub * sub))
        row_blk = min(row_cap, rows_al)
    else:
        # Chunk the spatial axis: modest row tile (vreg-friendly f32 accumulator),
        # spend the budget on a 128-multiple spatial chunk (tail masked in-kernel).
        row_blk = min(256, rows_al)
        hw_blk = max(_LANES,
                     min(_MAX_HW_TILE,
                         (budget // max(1, row_blk * itemsize)) // _LANES * _LANES))
        if hw_blk > hw:                    # defensive: full extent is always legal
            hw_blk = hw

    # Megacore (v7x): keep at least two tiles on the "parallel" row axis.
    if row_blk >= rows and rows > sub:
        row_blk = _round_up((rows + 1) // 2, sub)
    # Never let the row block exceed the row extent unless it *is* the full dim.
    if row_blk > rows:
        row_blk = rows
    return row_blk, hw_blk


def _global_pool_kernel(x_ref, o_ref, acc_ref, *, pool_type, hw, inv_hw):
    """Row-wise mean / mean-of-square / mean-abs over the flattened HW axis.

    x_ref:   (row_blk, hw_blk) input tile
    o_ref:   (row_blk, 1)      pooled output (written on the last HW chunk)
    acc_ref: (row_blk, 128)    f32 lane-group partial sums (deferred XLU reduce)
    """
    row_blk, hw_blk = x_ref.shape

    def _proc(v):
        v = v.astype(jnp.float32)          # per-chunk upcast (bf16/int8 friendly)
        if pool_type == "rms":
            v = v * v
        elif pool_type == "abs":
            v = jnp.abs(v)
        return v

    def _finish(total):
        m = total * inv_hw                 # exact divisor: H*W
        if pool_type == "rms":
            m = jax.lax.rsqrt(m)           # mean(x**2) ** (-0.5), on the EUP
        return m.astype(o_ref.dtype)

    if hw_blk % _LANES != 0:
        # Only reached when the block covers the full (non-128-aligned) spatial
        # extent, i.e. a single HW chunk: reduce directly, no accumulator.
        o_ref[...] = _finish(jnp.sum(_proc(x_ref[...]), axis=-1, keepdims=True))
        return

    j = pl.program_id(1)

    @pl.when(j == 0)
    def _init():
        acc_ref[...] = jnp.zeros_like(acc_ref)

    need_mask = (hw % hw_blk) != 0         # last HW chunk is partial (static)
    if need_mask:
        limit = hw - j * hw_blk            # valid columns in this chunk (>= hw_blk otherwise)
        col = jax.lax.broadcasted_iota(jnp.int32, (1, _LANES), 1)

    acc = acc_ref[...]
    # 128-aligned static slices: per-chunk upcast + square/abs + VPU add only;
    # the single cross-lane (XLU) reduce is deferred to the finalize step.
    for g in range(hw_blk // _LANES):
        xg = _proc(x_ref[:, g * _LANES:(g + 1) * _LANES])
        if need_mask:
            xg = jnp.where(col < (limit - g * _LANES), xg, 0.0)
        acc = acc + xg
    acc_ref[...] = acc

    @pl.when(j == pl.num_programs(1) - 1)
    def _finalize():
        o_ref[...] = _finish(jnp.sum(acc_ref[...], axis=-1, keepdims=True))


def global_pool(x, pool_type="mean", keep_dim=False, *, block_bytes=None):
    """Pallas implementation of GlobalPool.forward.

    x: (N, C, H, W) array. Returns (N, C), or (N, C, 1, 1) if keep_dim.
    """
    if pool_type not in POOL_TYPES:
        raise ValueError(f"Supported pool types are: {POOL_TYPES}. Got {pool_type}")
    assert x.ndim == 4, f"Got: {x.shape}"

    n, c, h, w = x.shape
    hw = h * w
    rows = n * c

    budget = block_bytes if block_bytes is not None else _block_byte_budget()
    row_blk, hw_blk = _choose_blocks(rows, hw, x.dtype.itemsize, budget)

    x_flat = x.reshape(rows, hw)           # contiguous NCHW -> no-copy view; no padding

    kernel = functools.partial(
        _global_pool_kernel, pool_type=pool_type, hw=hw, inv_hw=1.0 / hw)

    grid = (pl.cdiv(rows, row_blk), pl.cdiv(hw, hw_blk))   # reduction axis last

    out = pl.pallas_call(
        kernel,
        out_shape=jax.ShapeDtypeStruct((rows, 1), x.dtype),
        grid_spec=pltpu.PrefetchScalarGridSpec(
            num_scalar_prefetch=0,
            grid=grid,
            in_specs=[pl.BlockSpec((row_blk, hw_blk), lambda i, j: (i, j))],
            out_specs=pl.BlockSpec((row_blk, 1), lambda i, j: (i, 0)),
            scratch_shapes=[pltpu.VMEM((row_blk, _LANES), jnp.float32)],
        ),
        compiler_params=pltpu.CompilerParams(
            dimension_semantics=("parallel", "arbitrary")),
    )(x_flat)

    out = out[:, 0].reshape(n, c)
    if keep_dim:
        out = out.reshape(n, c, 1, 1)
    return out


def _reference(x, pool_type, keep_dim):
    if pool_type == "rms":
        return jnp.mean(x * x, axis=(-2, -1), keepdims=keep_dim) ** (-0.5)
    if pool_type == "abs":
        return jnp.mean(jnp.abs(x), axis=(-2, -1), keepdims=keep_dim)
    return jnp.mean(x, axis=(-2, -1), keepdims=keep_dim)


if __name__ == "__main__":
    key = jax.random.PRNGKey(0)

    # (shape, forced block-byte budget or None for the hardware default)
    cases = [
        ((2, 4, 16, 16), None),    # aligned, single HW chunk
        ((2, 3, 7, 9), None),      # rows < 8 + non-128 spatial: full-extent block path
        ((2, 4, 64, 64), None),    # larger single-chunk accumulation (32 lane groups)
        ((3, 4, 16, 16), None),    # >= 2 row tiles (megacore) + partial edge row block
        ((2, 4, 16, 18), 4096),    # forced HW chunking, masked partial tail chunk
        ((2, 4, 32, 33), 32768),   # forced chunking, tail block with fully-masked groups
    ]

    ok = True
    for shape, blk_bytes in cases:
        key, subkey = jax.random.split(key)
        x = jax.random.normal(subkey, shape, dtype=jnp.float32) + 0.5
        for pool_type in POOL_TYPES:
            for keep_dim in (False, True):
                out = global_pool(x, pool_type=pool_type, keep_dim=keep_dim,
                                  block_bytes=blk_bytes)
                out = jax.block_until_ready(out)
                ref = _reference(x, pool_type, keep_dim)
                if out.shape != ref.shape:
                    ok = False
                    print("SHAPE MISMATCH", shape, pool_type, keep_dim, out.shape, ref.shape)
                elif not jnp.allclose(out, ref, atol=1e-5, rtol=1e-4):
                    ok = False
                    print("VALUE MISMATCH", shape, pool_type, keep_dim)

    if ok:
        print("KERNEL_OK")
    else:
        print("KERNEL_MISMATCH")
</pallas_src>

<mosaic_0001>
module attributes {stable_mosaic.version = 11 : i64} {
  func.func @_global_pool_kernel(%arg0: i32, %arg1: i32, %arg2: memref<8x256xf32, #tpu.memory_space<vmem>>, %arg3: memref<8x1xf32, #tpu.memory_space<vmem>>, %arg4: memref<8x128xf32, #tpu.memory_space<vmem>>) attributes {dimension_semantics = [#tpu.dimension_semantics<parallel>, #tpu.dimension_semantics<arbitrary>], iteration_bounds = array<i64: 1, 1>, scalar_prefetch = 0 : i64, scratch_operands = 1 : i64, tpu.core_type = #tpu.core_type<tc>, window_params = [{transform_indices = @transform_0, window_bounds = array<i64: 8, 256>}, {transform_indices = @transform_1, window_bounds = array<i64: 8, 1>}]} {
    %c0_i32 = arith.constant 0 : i32
    %0 = arith.cmpi eq, %arg1, %c0_i32 : i32
    %1 = arith.extui %0 : i1 to i32
    %c0_i32_0 = arith.constant 0 : i32
    %2 = arith.cmpi ne, %1, %c0_i32_0 : i32
    scf.if %2 {
      %cst = arith.constant 0.000000e+00 : f32
      %12 = vector.broadcast %cst : f32 to vector<8x128xf32>
      %c0_9 = arith.constant 0 : index
      %c0_10 = arith.constant 0 : index
      %13 = vector.load %arg4[%c0_9, %c0_10] : memref<8x128xf32, #tpu.memory_space<vmem>>, vector<8x128xf32>
      tpu.vector_store %arg4[%c0_9, %c0_10], %12 {strides = array<i32>} : memref<8x128xf32, #tpu.memory_space<vmem>>, vector<8x128xf32>,
    } else {
    }
    %c0 = arith.constant 0 : index
    %c0_1 = arith.constant 0 : index
    %3 = vector.load %arg4[%c0, %c0_1] : memref<8x128xf32, #tpu.memory_space<vmem>>, vector<8x128xf32>
    %c0_2 = arith.constant 0 : index
    %c0_3 = arith.constant 0 : index
    %4 = vector.load %arg2[%c0_2, %c0_3] : memref<8x256xf32, #tpu.memory_space<vmem>>, vector<8x128xf32>
    %5 = arith.addf %3, %4 : vector<8x128xf32>
    %c0_4 = arith.constant 0 : index
    %c128 = arith.constant 128 : index
    %6 = vector.load %arg2[%c0_4, %c128] : memref<8x256xf32, #tpu.memory_space<vmem>>, vector<8x128xf32>
    %7 = arith.addf %5, %6 : vector<8x128xf32>
    %c0_5 = arith.constant 0 : index
    %c0_6 = arith.constant 0 : index
    %8 = vector.load %arg4[%c0_5, %c0_6] : memref<8x128xf32, #tpu.memory_space<vmem>>, vector<8x128xf32>
    tpu.vector_store %arg4[%c0_5, %c0_6], %7 {strides = array<i32>} : memref<8x128xf32, #tpu.memory_space<vmem>>, vector<8x128xf32>,
    %c0_i32_7 = arith.constant 0 : i32
    %9 = arith.cmpi eq, %arg1, %c0_i32_7 : i32
    %10 = arith.extui %9 : i1 to i32
    %c0_i32_8 = arith.constant 0 : i32
    %11 = arith.cmpi ne, %10, %c0_i32_8 : i32
    scf.if %11 {
      %c0_9 = arith.constant 0 : index
      %c0_10 = arith.constant 0 : index
      %12 = vector.load %arg4[%c0_9, %c0_10] : memref<8x128xf32, #tpu.memory_space<vmem>>, vector<8x128xf32>
      %cst = arith.constant dense<0.000000e+00> : vector<8xf32>
      %13 = vector.multi_reduction <add>, %12, %cst [1] : vector<8x128xf32> to vector<8xf32>
      %14 = vector.shape_cast %13 : vector<8xf32> to vector<8x1xf32>
      %cst_11 = arith.constant 3.906250e-03 : f32
      %15 = vector.broadcast %cst_11 : f32 to vector<8x1xf32>
      %16 = arith.mulf %14, %15 : vector<8x1xf32>
      %c0_12 = arith.constant 0 : index
      %c0_13 = arith.constant 0 : index
      %17 = vector.load %arg3[%c0_12, %c0_13] : memref<8x1xf32, #tpu.memory_space<vmem>>, vector<8x1xf32>
      tpu.vector_store %arg3[%c0_12, %c0_13], %16 {strides = array<i32>} : memref<8x1xf32, #tpu.memory_space<vmem>>, vector<8x1xf32>,
    } else {
    }
    return
  }
  func.func @transform_0(%arg0: i32, %arg1: i32) -> (i32, i32) {
    %c0_i32 = arith.constant 0 : i32
    return %arg0, %arg1 : i32, i32
  }
  func.func @transform_1(%arg0: i32, %arg1: i32) -> (i32, i32) {
    %c0_i32 = arith.constant 0 : i32
    %c0_i32_0 = arith.constant 0 : i32
    return %arg0, %c0_i32 : i32, i32
  }
}

</mosaic_0001>

<bundles_post_ra>
// kernel: tpu_custom_call.1
= control target key start
LH: loop header
LB: loop body
LE: loop exit
PB: predicated region body
PF: predicated region fallthrough
CT: control target
= control target key end

     0   :  { %6 = vsyncpa [#allocation4], 0  ;;  %s70_s6 = smov [#allocation3]   ;;  %s96_s0 = inlined_call_operand.hbm [shape: f32[8,256], index: 0, kind: input, shape index: {}]   ;;  %s97_s1 = inlined_call_operand.vmem [shape: f32[8,1], index: 1, kind: output, shape index: {}]  }
   0x1   :  { %s13_s7 = sshll.u32 %s70_s6, 4  ;;  %s46_s10 = scalar_lea.hbm %s96_s0, 256  ;;  %s14_s7 = int_to_ptr.vmem [resolvable:$true] %s13_s7 }
   0x2   :  { %p47_p0 = scmp.ne.s32.totalorder %s96_s0, %s46_s10  ;;  %p50_p1 = scmp.lt.u32.totalorder %s46_s10, %s96_s0 }
   0x4   :  { %p52_p2 = pnand %p50_p1, %p47_p0 }
   0x6   :  { %55 = shalt.err (!%p52_p2)
}
   0x7   :  { %s56_s15 = scalar_lea.vmem %s14_s7, 256  ;;  %p61_p4 = scmp.lt.s32.totalorder %s14_s7, %s14_s7 }
   0x8   :  { %p57_p3 = scmp.ne.s32.totalorder %s14_s7, %s56_s15  ;;  %p62_p5 = scmp.lt.s32.totalorder %s56_s15, %s56_s15 }
   0xa   :  { %p63_p6 = por %p62_p5, %p61_p4 }
   0xc   :  { %p64_p7 = pnand %p63_p6, %p57_p3 }
   0xe   :  { %67 = shalt.err (!%p64_p7)
}
   0xf   :  { %16 = dma.hbm_to_vmem [thread:$0]  %s96_s0, 256, %s14_s7, [#allocation4]  }
  0x10   :  { %68 = dma.done.wait [#allocation4], 256  }
  0x11   :  { %69 = vsyncadd [#allocation4], 4294967040  ;;  %v26_v0 = vld [vmem:[#allocation3] sm:$0xff]  ;;  %v28_v1 = vld [vmem:[#allocation3 + $0x8] sm:$0xff]  ;;  %vm38_vm0 = vcmask 7168  }
  0x12   :  { %v29_v2 = vadd.f32 %v28_v1, %v26_v0 }
  0x14   :  { %35 = vadd.xlane.f32.xlu0 %v29_v2 }
  0xa1   :  { %v36_v3 = vpop.xlane.xlu0 %35 }
  0xa2   :  { %v37_v4 = vmul.f32 0.00390625, %v36_v3 }
  0xa4   :  { %39 = vst.msk [vmem:[%s97_s1] sm:$0xff] %vm38_vm0, %v37_v4 }
  0xa5   :  { %44 = vsyncpa [#allocation4], 1 }

</bundles_post_ra>
